<compile_context>
chip_gen: v6e
topology: v6e:2x2x1
jax: 0.10.0
libtpu: 0.0.40
codegen_flags: <defaults>
</compile_context>

<pallas_src>
import jax
import jax.numpy as jnp
from jax import lax
from jax.experimental import pallas as pl
from jax.experimental.pallas import tpu as pltpu


def _round_up(x, m):
    return (x + m - 1) // m * m


# ---------------------------------------------------------------------------
# Kernel A: whole (padded) vocab fits in one tile -> single pass per row tile.
# x_ref: (tm, ff) bf16, w_ref: (vocab_p, ff) bf16, b_ref: (1, vocab_p) f32,
# o_ref: (tm, vocab_p) f32
# ---------------------------------------------------------------------------
def _outputs_single_kernel(x_ref, w_ref, b_ref, o_ref):
    logits = lax.dot_general(
        x_ref[...], w_ref[...],
        dimension_numbers=(((1,), (1,)), ((), ())),   # x @ W^T on the MXU
        preferred_element_type=jnp.float32,
    ) + b_ref[...]
    m = jnp.max(logits, axis=-1, keepdims=True)
    e = jnp.exp(logits - m)
    denom = jnp.sum(e, axis=-1, keepdims=True)
    o_ref[...] = (e * pl.reciprocal(denom, approx=True)).astype(o_ref.dtype)


# ---------------------------------------------------------------------------
# Kernel B: vocab tiled.  grid = (rows, phase, vocab_tiles).
#   phase 0: online running max / sum-exp over vocab tiles (VMEM scratch),
#            output block index pinned to (i, 0) so nothing is flushed.
#   phase 1: recompute the logits tile and write exp(logit - m) / l.
# ---------------------------------------------------------------------------
def _outputs_tiled_kernel(x_ref, w_ref, b_ref, o_ref, m_ref, l_ref):
    p = pl.program_id(1)
    j = pl.program_id(2)

    @pl.when((p == 0) & (j == 0))
    def _():
        m_ref[...] = jnp.full_like(m_ref, -jnp.inf)
        l_ref[...] = jnp.zeros_like(l_ref)

    logits = lax.dot_general(
        x_ref[...], w_ref[...],
        dimension_numbers=(((1,), (1,)), ((), ())),
        preferred_element_type=jnp.float32,
    ) + b_ref[...]

    @pl.when(p == 0)
    def _():
        m_prev = m_ref[...]
        m_new = jnp.maximum(m_prev, jnp.max(logits, axis=-1, keepdims=True))
        l_ref[...] = (l_ref[...] * jnp.exp(m_prev - m_new)
                      + jnp.sum(jnp.exp(logits - m_new), axis=-1, keepdims=True))
        m_ref[...] = m_new

    @pl.when(p == 1)
    def _():
        inv_l = pl.reciprocal(l_ref[...], approx=True)
        o_ref[...] = (jnp.exp(logits - m_ref[...]) * inv_l).astype(o_ref.dtype)


def outputs_forward(x, weight, bias, *, tm=256, tn=1024,
                    compute_dtype=jnp.bfloat16):
    """softmax(x @ W^T + b, axis=-1), matching the PyTorch `Outputs` module.

    x:      [..., ff]
    weight: [vocab, ff]   (native nn.Linear layout, NOT pre-transposed)
    bias:   [vocab]
    Returns float32 probabilities of shape [..., vocab].
    """
    orig_shape = x.shape
    ff = orig_shape[-1]
    vocab, ff_w = weight.shape
    assert ff_w == ff

    x2d = x.reshape(-1, ff)
    M = x2d.shape[0]

    # Row tile: large (MXU rows / per-step overhead), multiple of 8 sublanes.
    tm_eff = min(tm, _round_up(M, 8))
    M_p = _round_up(M, tm_eff)
    grid_rows = M_p // tm_eff

    # Vocab tile: multiple of 128 lanes.
    tn_eff = min(tn, _round_up(vocab, 128))
    vocab_p = _round_up(vocab, tn_eff)
    nv = vocab_p // tn_eff

    # Pad + cast.  Padded vocab columns get a very negative bias so their
    # softmax probability is exactly 0; padded rows are sliced off afterwards.
    x_p = jnp.pad(x2d.astype(compute_dtype), ((0, M_p - M), (0, 0)))
    w_p = jnp.pad(weight.astype(compute_dtype), ((0, vocab_p - vocab), (0, 0)))
    b_p = jnp.pad(bias.astype(jnp.float32).reshape(1, vocab),
                  ((0, 0), (0, vocab_p - vocab)), constant_values=-1e30)

    cparams = pltpu.CompilerParams(
        dimension_semantics=(("parallel",) if nv == 1
                             else ("parallel", "arbitrary", "arbitrary")),
        vmem_limit_bytes=64 * 1024 * 1024,
    )

    if nv == 1:
        out = pl.pallas_call(
            _outputs_single_kernel,
            out_shape=jax.ShapeDtypeStruct((M_p, vocab_p), jnp.float32),
            grid_spec=pltpu.PrefetchScalarGridSpec(
                num_scalar_prefetch=0,
                grid=(grid_rows,),
                in_specs=[
                    pl.BlockSpec((tm_eff, ff), lambda i: (i, 0)),
                    pl.BlockSpec((vocab_p, ff), lambda i: (0, 0)),
                    pl.BlockSpec((1, vocab_p), lambda i: (0, 0)),
                ],
                out_specs=pl.BlockSpec((tm_eff, vocab_p), lambda i: (i, 0)),
            ),
            compiler_params=cparams,
        )(x_p, w_p, b_p)
    else:
        out = pl.pallas_call(
            _outputs_tiled_kernel,
            out_shape=jax.ShapeDtypeStruct((M_p, vocab_p), jnp.float32),
            grid_spec=pltpu.PrefetchScalarGridSpec(
                num_scalar_prefetch=0,
                grid=(grid_rows, 2, nv),
                in_specs=[
                    pl.BlockSpec((tm_eff, ff), lambda i, p, j: (i, 0)),
                    pl.BlockSpec((tn_eff, ff), lambda i, p, j: (j, 0)),
                    pl.BlockSpec((1, tn_eff), lambda i, p, j: (0, j)),
                ],
                # phase 0: pinned to block (i, 0) (never written, never
                # flushed); phase 1: write block (i, j).
                out_specs=pl.BlockSpec((tm_eff, tn_eff),
                                       lambda i, p, j: (i, j * p)),
                scratch_shapes=[
                    pltpu.VMEM((tm_eff, 1), jnp.float32),   # running max
                    pltpu.VMEM((tm_eff, 1), jnp.float32),   # running sum-exp
                ],
            ),
            compiler_params=cparams,
        )(x_p, w_p, b_p)

    out = out[:M, :vocab]
    return out.reshape(*orig_shape[:-1], vocab)


def _reference(x, weight, bias, compute_dtype=jnp.bfloat16):
    # Reference matching the kernel's bf16 operand quantization (f32 math).
    xq = x.astype(compute_dtype).astype(jnp.float32)
    wq = weight.astype(compute_dtype).astype(jnp.float32)
    logits = xq @ wq.T + bias.astype(jnp.float32)
    return jax.nn.softmax(logits, axis=-1)


if __name__ == "__main__":
    key = jax.random.PRNGKey(0)

    # --- Test 1: single-tile vocab path (batch=2, seq=8, ff=32, vocab=128) ---
    batch, seq, ff_size, vocab_size = 2, 8, 32, 128
    k1, k2, k3, key = jax.random.split(key, 4)
    x = jax.random.normal(k1, (batch, seq, ff_size), dtype=jnp.float32)
    bound = 1.0 / (ff_size ** 0.5)
    w = jax.random.uniform(k2, (vocab_size, ff_size), jnp.float32, -bound, bound)
    b = jax.random.uniform(k3, (vocab_size,), jnp.float32, -bound, bound)

    out = jax.block_until_ready(outputs_forward(x, w, b))
    ref = _reference(x, w, b)
    assert out.shape == (batch, seq, vocab_size)
    assert jnp.allclose(out, ref, atol=2e-3, rtol=2e-2), \
        float(jnp.max(jnp.abs(out - ref)))
    assert jnp.allclose(jnp.sum(out, axis=-1), 1.0, atol=5e-3)

    # --- Test 2: vocab-tiled two-pass path + row/vocab padding -------------
    batch2, seq2, ff2, vocab2 = 2, 7, 32, 200   # M=14 -> padded rows, 2 vocab tiles
    k1, k2, k3, key = jax.random.split(key, 4)
    x2 = jax.random.normal(k1, (batch2, seq2, ff2), dtype=jnp.float32)
    bound2 = 1.0 / (ff2 ** 0.5)
    w2 = jax.random.uniform(k2, (vocab2, ff2), jnp.float32, -bound2, bound2)
    b2 = jax.random.uniform(k3, (vocab2,), jnp.float32, -bound2, bound2)

    out2 = jax.block_until_ready(outputs_forward(x2, w2, b2, tn=128))
    ref2 = _reference(x2, w2, b2)
    assert out2.shape == (batch2, seq2, vocab2)
    assert jnp.allclose(out2, ref2, atol=2e-3, rtol=2e-2), \
        float(jnp.max(jnp.abs(out2 - ref2)))
    assert jnp.allclose(jnp.sum(out2, axis=-1), 1.0, atol=5e-3)

    print("KERNEL_OK")
</pallas_src>

<mosaic_0001>
module attributes {stable_mosaic.version = 11 : i64} {
  func.func @_outputs_single_kernel(%arg0: i32, %arg1: memref<16x32xbf16, #tpu.memory_space<vmem>>, %arg2: memref<128x32xbf16, #tpu.memory_space<vmem>>, %arg3: memref<1x128xf32, #tpu.memory_space<vmem>>, %arg4: memref<16x128xf32, #tpu.memory_space<vmem>>) attributes {dimension_semantics = [#tpu.dimension_semantics<parallel>], iteration_bounds = array<i64: 1>, scalar_prefetch = 0 : i64, scratch_operands = 0 : i64, tpu.core_type = #tpu.core_type<tc>, window_params = [{transform_indices = @transform_0, window_bounds = array<i64: 16, 32>}, {pipeline_mode = #tpu.pipeline_mode<synchronous>, transform_indices = @transform_1, window_bounds = array<i64: 128, 32>}, {pipeline_mode = #tpu.pipeline_mode<synchronous>, transform_indices = @transform_2, window_bounds = array<i64: 1, 128>}, {transform_indices = @transform_3, window_bounds = array<i64: 16, 128>}]} {
    %c0 = arith.constant 0 : index
    %c0_0 = arith.constant 0 : index
    %0 = vector.load %arg1[%c0, %c0_0] : memref<16x32xbf16, #tpu.memory_space<vmem>>, vector<16x32xbf16>
    %c0_1 = arith.constant 0 : index
    %c0_2 = arith.constant 0 : index
    %1 = vector.load %arg2[%c0_1, %c0_2] : memref<128x32xbf16, #tpu.memory_space<vmem>>, vector<128x32xbf16>
    %cst = arith.constant dense<0.000000e+00> : vector<16x128xf32>
    %2 = tpu.matmul %0, %1, %cst {dimension_numbers = #tpu.dot_dimension_numbers<[1], [1], [0], [0], [0, 0, 1, 0], [], []>} : vector<16x32xbf16>, vector<128x32xbf16>, vector<16x128xf32> -> vector<16x128xf32>
    %c0_3 = arith.constant 0 : index
    %c0_4 = arith.constant 0 : index
    %3 = vector.load %arg3[%c0_3, %c0_4] : memref<1x128xf32, #tpu.memory_space<vmem>>, vector<1x128xf32>
    %4 = vector.broadcast %3 : vector<1x128xf32> to vector<16x128xf32>
    %5 = arith.addf %2, %4 : vector<16x128xf32>
    %cst_5 = arith.constant dense<0xFF800000> : vector<16xf32>
    %6 = vector.multi_reduction <maximumf>, %5, %cst_5 [1] : vector<16x128xf32> to vector<16xf32>
    %7 = vector.shape_cast %6 : vector<16xf32> to vector<16x1xf32>
    %8 = vector.broadcast %7 : vector<16x1xf32> to vector<16x128xf32>
    %9 = arith.subf %5, %8 : vector<16x128xf32>
    %10 = math.exp %9 : vector<16x128xf32>
    %cst_6 = arith.constant dense<0.000000e+00> : vector<16xf32>
    %11 = vector.multi_reduction <add>, %10, %cst_6 [1] : vector<16x128xf32> to vector<16xf32>
    %12 = vector.shape_cast %11 : vector<16xf32> to vector<16x1xf32>
    %13 = tpu.reciprocal %12 {approx = true} : vector<16x1xf32> -> vector<16x1xf32>
    %14 = vector.broadcast %13 : vector<16x1xf32> to vector<16x128xf32>
    %15 = arith.mulf %10, %14 : vector<16x128xf32>
    %c0_7 = arith.constant 0 : index
    %c0_8 = arith.constant 0 : index
    %16 = vector.load %arg4[%c0_7, %c0_8] : memref<16x128xf32, #tpu.memory_space<vmem>>, vector<16x128xf32>
    tpu.vector_store %arg4[%c0_7, %c0_8], %15 {strides = array<i32>} : memref<16x128xf32, #tpu.memory_space<vmem>>, vector<16x128xf32>,
    return
  }
  func.func @transform_0(%arg0: i32) -> (i32, i32) {
    %c0_i32 = arith.constant 0 : i32
    %c0_i32_0 = arith.constant 0 : i32
    return %arg0, %c0_i32 : i32, i32
  }
  func.func @transform_1(%arg0: i32) -> (i32, i32) {
    %c0_i32 = arith.constant 0 : i32
    %c0_i32_0 = arith.constant 0 : i32
    %c0_i32_1 = arith.constant 0 : i32
    return %c0_i32, %c0_i32_0 : i32, i32
  }
  func.func @transform_2(%arg0: i32) -> (i32, i32) {
    %c0_i32 = arith.constant 0 : i32
    %c0_i32_0 = arith.constant 0 : i32
    %c0_i32_1 = arith.constant 0 : i32
    return %c0_i32, %c0_i32_0 : i32, i32
  }
  func.func @transform_3(%arg0: i32) -> (i32, i32) {
    %c0_i32 = arith.constant 0 : i32
    %c0_i32_0 = arith.constant 0 : i32
    return %arg0, %c0_i32 : i32, i32
  }
}

</mosaic_0001>

<bundles_post_ra>
// kernel: tpu_custom_call.1
= control target key start
LH: loop header
LB: loop body
LE: loop exit
PB: predicated region body
PF: predicated region fallthrough
CT: control target
= control target key end

     0   :  { %v275_v1 = vmov 0.0   ;;  %vm86_vm0 = vcmask 261120   ;;  %vm276_vm1 = vmmov 0   ;;  %s342_s0 = inlined_call_operand.vmem [shape: bf16[16,32], index: 0, kind: input, shape index: {}]   ;;  %s343_s1 = inlined_call_operand.vmem [shape: bf16[128,32], index: 1, kind: input, shape index: {}]   ;;  %s344_s2 = inlined_call_operand.vmem [shape: f32[1,128], index: 2, kind: input, shape index: {}]   ;;  %s345_s3 = inlined_call_operand.hbm [shape: f32[16,128], index: 3, kind: output, shape index: {}]  }
   0x1   :  { %v236_v0 = vld [vmem:[%s343_s1 + $0x38] sm:$0xff]   ;;  %211 = vmatprep.subr.bf16.mxu0 %v275_v1  ;;  %v237_v3 = vld [vmem:[%s343_s1 + $0x30] sm:$0xff]   ;;  %227 = vmatprep.mubr.msk.bf16.mxu0 %vm276_vm1, %v275_v1 }
   0x2   :  { %v112_v2 = vsel %vm86_vm0, %v236_v0, 0  ;;  %v109_v4 = vsel %vm86_vm0, %v237_v3, 0 }
   0x3   :  { %212 = vmatpush3.bf16.xpose.msra.mxu0 %v112_v2 }
   0x4   :  { %213 = vmatprep.subr.bf16.mxu0 %v275_v1 }
   0x5   :  { %8 = vsyncpa [#allocation3], 0  ;;  %v238_v5 = vld [vmem:[%s343_s1 + $0x28] sm:$0xff]   ;;  %v239_v7 = vld [vmem:[%s343_s1 + $0x20] sm:$0xff]  }
   0x6   :  { %v106_v6 = vsel %vm86_vm0, %v238_v5, 0  ;;  %v103_v8 = vsel %vm86_vm0, %v239_v7, 0  ;;  %v240_v9 = vld [vmem:[%s343_s1 + $0x18] sm:$0xff]   ;;  %v241_v11 = vld [vmem:[%s343_s1 + $0x10] sm:$0xff]   ;;  %v242_v13 = vld [vmem:[%s343_s1 + $0x8] sm:$0xff]  }
   0x7   :  { %v100_v10 = vsel %vm86_vm0, %v240_v9, 0  ;;  %v97_v12 = vsel %vm86_vm0, %v241_v11, 0  ;;  %v94_v14 = vsel %vm86_vm0, %v242_v13, 0  ;;  %v243_v15 = vld [vmem:[%s343_s1] sm:$0xff]  }
   0x8   :  { %v91_v16 = vsel %vm86_vm0, %v243_v15, 0  ;;  %v244_v17 = vld [vmem:[%s342_s0] sm:$0xff]   ;;  %s277_s0 = smov [#allocation2]  }
   0x9   :  { %v191_v18 = vld [vmem:[%s344_s2] ss:$0 sm:$0xff]  ;;  %s180_s1 = sshll.u32 %s277_s0, 4  ;;  %s181_s1 = int_to_ptr.vmem [resolvable:$true] %s180_s1 }
   0xa   :  { %s253_s2 = scalar_lea.vmem %s181_s1, 256  ;;  %p258_p1 = scmp.lt.s32.totalorder %s181_s1, %s181_s1 }
   0xb   :  { %214 = vmatpush3.bf16.xpose.msra.mxu0 %v109_v4  ;;  %p254_p0 = scmp.ne.s32.totalorder %s181_s1, %s253_s2  ;;  %p259_p2 = scmp.lt.s32.totalorder %s253_s2, %s253_s2 }
   0xc   :  { %215 = vmatprep.subr.bf16.mxu0 %v275_v1 }
   0xd   :  { %p260_p3 = por %p259_p2, %p258_p1 }
   0xf   :  { %p261_p4 = pnand %p260_p3, %p254_p0 }
  0x13   :  { %216 = vmatpush3.bf16.xpose.msra.mxu0 %v106_v6 }
  0x14   :  { %217 = vmatprep.subr.bf16.mxu0 %v275_v1 }
  0x1b   :  { %218 = vmatpush3.bf16.xpose.msra.mxu0 %v103_v8 }
  0x1c   :  { %219 = vmatprep.subr.bf16.mxu0 %v275_v1 }
  0x23   :  { %220 = vmatpush3.bf16.xpose.msra.mxu0 %v100_v10 }
  0x24   :  { %221 = vmatprep.subr.bf16.mxu0 %v275_v1 }
  0x2b   :  { %222 = vmatpush3.bf16.xpose.msra.mxu0 %v97_v12 }
  0x2c   :  { %223 = vmatprep.subr.bf16.mxu0 %v275_v1 }
  0x33   :  { %224 = vmatpush3.bf16.xpose.msra.mxu0 %v94_v14 }
  0x34   :  { %225 = vmatprep.subr.bf16.mxu0 %v275_v1 }
  0x3b   :  { %226 = vmatpush3.bf16.xpose.msra.mxu0 %v91_v16 }
  0x42   :  { %228 = vmatmul.mubr.msk.bf16.vlgmr.msra.gmra.mxu0 %vm86_vm0, %v244_v17 }
 0x102   :  { %v148_v19 = vpop.f32.mrf.mxu0 }
 0x103   :  { %v149_v20 = vadd.f32 %v191_v18, %v148_v19 }
 0x104   :  { %v229_v21 = vpop.f32.mrf.mxu0 }
 0x105   :  { %155 = vmax.xlane.f32.xlu0 %v149_v20 }
 0x106   :  { %v151_v22 = vpop.f32.mrf.mxu0 }
 0x107   :  { %v152_v23 = vadd.f32 %v191_v18, %v151_v22 }
 0x108   :  { %v230_v24 = vpop.f32.mrf.mxu0 }
 0x109   :  { %157 = vmax.xlane.f32.xlu0 %v152_v23 }
 0x18e   :  { %v156_v25 = vpop.xlane.xlu0 %155 }
 0x18f   :  { %v159_v26 = vsub.f32 %v149_v20, %v156_v25 }
 0x191   :  { %v161_v27 = vmul.f32 1.442695, %v159_v26 }
 0x192   :  { %v158_v28 = vpop.xlane.xlu0 %157 }
 0x193   :  { %245 = vpow2.f32 %v161_v27  ;;  %v160_v29 = vsub.f32 %v152_v23, %v158_v28 }
 0x195   :  { %v163_v30 = vmul.f32 1.442695, %v160_v29 }
 0x197   :  { %247 = vpow2.f32 %v163_v30 }
 0x1a0   :  { %v246_v31 = vpop.eup %245 }
 0x1a1   :  { %165 = vadd.xlane.f32.xlu1 %v246_v31 }
 0x1a4   :  { %v248_v32 = vpop.eup %247 }
 0x1a5   :  { %167 = vadd.xlane.f32.xlu1 %v248_v32 }
 0x22a   :  { %v166_v33 = vpop.xlane.xlu1 %165 }
 0x22b   :  { %249 = vrcp.f32 %v166_v33 }
 0x22e   :  { %v168_v34 = vpop.xlane.xlu1 %167 }
 0x22f   :  { %251 = vrcp.f32 %v168_v34 }
 0x238   :  { %v250_v35 = vpop.eup %249 }
 0x239   :  { %v171_v36 = vmul.f32 %v250_v35, %v246_v31 }
 0x23b   :  { %173 = vst [vmem:[#allocation2] sm:$0xff] %v171_v36 }
 0x23c   :  { %v252_v37 = vpop.eup %251 }
 0x23d   :  { %v172_v38 = vmul.f32 %v252_v37, %v248_v32 }
 0x23f   :  { %174 = vst [vmem:[#allocation2 + $0x8] sm:$0xff] %v172_v38 }
 0x240   :  { %264 = shalt.err (!%p261_p4)
}
 0x241   :  { %s278_s5 = smov 128   ;;  %s279_s6 = smov 8  }
 0x242   :  { %186 = dma.vmem_to_hbm [thread:$0]  %s181_s1, 256, %s345_s3, [#allocation3], %s278_s5, %s278_s5, %s279_s6  }
 0x243   :  { %273 = dma.done.wait [#allocation3], 256  }
 0x244   :  { %274 = vsyncadd [#allocation3], 4294967040 }
 0x245   :  { %190 = vsyncpa [#allocation3], 1 }

</bundles_post_ra>
